<compile_context>
chip_gen: v6e
topology: v6e:2x2x1
jax: 0.10.0
libtpu: 0.0.40
codegen_flags: <defaults>
</compile_context>

<pallas_src>
import functools

import jax
import jax.numpy as jnp
from jax import lax
from jax.experimental import pallas as pl
from jax.experimental.pallas import tpu as pltpu


def _round_up(a: int, m: int) -> int:
    return ((a + m - 1) // m) * m


def _npairs_loss_kernel(x_ref, tgt_row_ref, tgt_col_ref, prt_row_ref,
                        prt_col_ref, out_ref, *, tm: int, n_valid: int):
    i = pl.program_id(0)
    n_pad = x_ref.shape[0]

    # Row tile of the (already L2-normalized, bf16) feature matrix.
    row0 = pl.multiple_of(i * tm, tm)
    xr = x_ref[pl.ds(row0, tm), :]                     # (tm, d)    bf16
    xn = x_ref[...]                                    # (n_pad, d) bf16

    # (tm, n_pad) stripe of prod = inputs @ inputs.T  (bf16 MXU, f32 accum;
    # contraction on the last dim of both operands -> no explicit transpose).
    prod = lax.dot_general(
        xr, xn,
        dimension_numbers=(((1,), (1,)), ((), ())),
        preferred_element_type=jnp.float32)            # (tm, n_pad) f32

    tgt_r = tgt_row_ref[...]                           # (1, n_pad)
    tgt_c = tgt_col_ref[...]                           # (tm, 1)
    prt_r = prt_row_ref[...]                           # (1, n_pad)
    prt_c = prt_col_ref[...]                           # (tm, 1)

    same_class = tgt_c == tgt_r                        # (tm, n_pad)
    same_part = prt_c == prt_r

    # Validity masks for padded rows / columns (iota, no extra IO).
    col_ids = lax.broadcasted_iota(jnp.int32, (1, n_pad), 1)
    row_ids = lax.broadcasted_iota(jnp.int32, (tm, 1), 0) + i * tm
    valid = jnp.logical_and(row_ids < n_valid, col_ids < n_valid)

    sasc = jnp.logical_and(same_class, same_part)                  # positives
    dadc = jnp.logical_and(jnp.logical_not(same_class),
                           jnp.logical_not(same_part))

    neg_all = jnp.logical_and(jnp.logical_not(sasc), valid)        # sadc|dasc|dadc
    dadc_v = jnp.logical_and(dadc, valid)
    # Anchors of all three loss terms: sasc | sadc | dasc == same_class | same_part.
    anchors = jnp.logical_and(jnp.logical_or(same_class, same_part), valid)

    # Single exp sweep over the stripe (prod in [-1, 1] -> never overflows).
    exp_prod = jnp.exp(prod)
    s_all = jnp.sum(jnp.where(neg_all, exp_prod, 0.0), axis=1, keepdims=True)
    s_dadc = jnp.sum(jnp.where(dadc_v, exp_prod, 0.0), axis=1, keepdims=True)

    # Per-anchor negative sum: sasc anchors use s_all, sadc/dasc use s_dadc.
    s_sel = jnp.where(sasc, s_all, s_dadc)             # (tm, n_pad) via broadcast
    # log(1 + exp(-p) * S) == log(exp(p) + S) - p  -> single log sweep, no recip.
    term = jnp.log(exp_prod + s_sel) - prod

    # Reduce over rows (sublanes) -> lane-dense (1, n_pad) per-stripe partials.
    col_part = jnp.sum(jnp.where(anchors, term, 0.0), axis=0, keepdims=True)
    out_ref[...] = col_part.reshape(1, 1, n_pad)


def _choose_tiles(n: int, d: int, tile_m: int):
    """Row-tile size + padded n.  Keeps padding < 16 rows per tile and bounds
    the estimated VMEM footprint (resident bf16 x + ~8 f32 stripe temps) to a
    cross-generation-safe ~48 MiB (v7x has 64 MiB / TensorCore)."""
    budget = 48 << 20
    n_steps = max(1, -(-n // tile_m))
    while True:
        tm = _round_up(-(-n // n_steps), 16)
        n_pad = tm * n_steps
        est = n_pad * d * 2 + 8 * tm * n_pad * 4
        if est <= budget or tm <= 16:
            return tm, n_pad
        n_steps += 1


def npairs_loss(inputs, targets, *, tile_m: int = 256):
    """inputs: (b, p, d) float; targets: (b,) int labels. Returns scalar f32."""
    b, p, d = inputs.shape
    n = b * p

    # --- glue (plain JAX, done ONCE): flatten, F.normalize(p=2, dim=1),
    #     per-row class / part ids.  Normalization hoisted out of the kernel.
    x = inputs.reshape(n, d).astype(jnp.float32)
    norm = jnp.sqrt(jnp.sum(x * x, axis=1, keepdims=True))
    xn = (x / jnp.maximum(norm, 1e-12)).astype(jnp.bfloat16)    # bf16 MXU operands
    tgt = jnp.repeat(targets.astype(jnp.int32), p)              # (n,)
    prt = jnp.tile(jnp.arange(p, dtype=jnp.int32), b)           # (n,)

    tm, n_pad = _choose_tiles(n, d, tile_m)
    if n_pad != n:
        pad = n_pad - n
        xn = jnp.pad(xn, ((0, pad), (0, 0)))
        tgt = jnp.pad(tgt, (0, pad), constant_values=-1)
        prt = jnp.pad(prt, (0, pad), constant_values=-2)

    grid = n_pad // tm
    kernel = functools.partial(_npairs_loss_kernel, tm=tm, n_valid=n)

    # VMEM limit derived from actual shapes (resident bf16 x + f32 stripe temps).
    vmem_limit = n_pad * d * 2 + 12 * tm * n_pad * 4 + (2 << 20)
    vmem_limit = max(32 << 20, min(vmem_limit, 100 << 20))

    def build(use_buffered: bool):
        def const_spec(shape):
            idx = lambda i, _s=shape: (0,) * len(_s)
            if use_buffered:
                return pl.BlockSpec(shape, idx, pipeline_mode=pl.Buffered(1))
            return pl.BlockSpec(shape, idx)

        return pl.pallas_call(
            kernel,
            out_shape=jax.ShapeDtypeStruct((grid, 1, n_pad), jnp.float32),
            grid=(grid,),
            in_specs=[
                const_spec((n_pad, d)),                       # normalized features
                const_spec((1, n_pad)),                       # class ids (row)
                pl.BlockSpec((tm, 1), lambda i: (i, 0)),      # class ids (col tile)
                const_spec((1, n_pad)),                       # part ids (row)
                pl.BlockSpec((tm, 1), lambda i: (i, 0)),      # part ids (col tile)
            ],
            out_specs=pl.BlockSpec((1, 1, n_pad), lambda i: (i, 0, 0)),
            compiler_params=pltpu.CompilerParams(
                dimension_semantics=("parallel",),
                vmem_limit_bytes=vmem_limit,
            ),
        )

    args = (xn, tgt.reshape(1, n_pad), tgt.reshape(n_pad, 1),
            prt.reshape(1, n_pad), prt.reshape(n_pad, 1))
    try:
        partials = build(True)(*args)
    except Exception:
        # pl.Buffered(1) not accepted by this jax build -> default double buffering.
        partials = build(False)(*args)

    # Padded rows/columns contribute exactly 0; divide by the true n = b * p.
    return jnp.sum(partials) / n


def _npairs_loss_ref(inputs, targets):
    """Plain-JAX f32 reference (vectorized form of the PyTorch loop)."""
    b, p, d = inputs.shape
    n = b * p
    x = inputs.reshape(n, d).astype(jnp.float32)
    x = x / jnp.maximum(jnp.linalg.norm(x, axis=1, keepdims=True), 1e-12)
    tgt = jnp.repeat(targets, p)
    prt = jnp.tile(jnp.arange(p), b)
    prod = x @ x.T
    same_c = tgt[:, None] == tgt[None, :]
    same_p = prt[:, None] == prt[None, :]
    sasc = same_c & same_p
    dadc = (~same_c) & (~same_p)
    xorm = jnp.logical_xor(same_c, same_p)
    e = jnp.exp(prod)
    s_all = jnp.sum(jnp.where(~sasc, e, 0.0), axis=1, keepdims=True)
    s_dadc = jnp.sum(jnp.where(dadc, e, 0.0), axis=1, keepdims=True)
    t1 = jnp.where(sasc, jnp.log(1.0 + jnp.exp(-prod) * s_all), 0.0)
    t2 = jnp.where(xorm, jnp.log(1.0 + jnp.exp(-prod) * s_dadc), 0.0)
    return (jnp.sum(t1) + jnp.sum(t2)) / n


if __name__ == "__main__":
    key = jax.random.PRNGKey(0)
    k_feat, k_tgt = jax.random.split(key)

    b, p, d = 2, 4, 32                       # batch, parts, feat_dim -> n = 8
    inputs = jax.random.normal(k_feat, (b, p, d), dtype=jnp.float32)
    targets = jax.random.randint(k_tgt, (b,), 0, 3, dtype=jnp.int32)

    loss = npairs_loss(inputs, targets)
    jax.block_until_ready(loss)

    ref = _npairs_loss_ref(inputs, targets)
    # bf16 MXU operands (f32 accumulation) -> small bounded deviation vs f32 ref.
    assert jnp.allclose(loss, ref, rtol=2e-2, atol=1e-2), (loss, ref)

    print("KERNEL_OK")
</pallas_src>

<mosaic_0001>
module attributes {stable_mosaic.version = 11 : i64} {
  func.func @_npairs_loss_kernel(%arg0: i32, %arg1: memref<16x32xbf16, #tpu.memory_space<vmem>>, %arg2: memref<1x16xi32, #tpu.memory_space<vmem>>, %arg3: memref<16x1xi32, #tpu.memory_space<vmem>>, %arg4: memref<1x16xi32, #tpu.memory_space<vmem>>, %arg5: memref<16x1xi32, #tpu.memory_space<vmem>>, %arg6: memref<1x1x16xf32, #tpu.memory_space<vmem>>) attributes {dimension_semantics = [#tpu.dimension_semantics<parallel>], iteration_bounds = array<i64: 1>, scalar_prefetch = 0 : i64, scratch_operands = 0 : i64, tpu.core_type = #tpu.core_type<tc>, window_params = [{pipeline_mode = #tpu.pipeline_mode<synchronous>, transform_indices = @transform_0, window_bounds = array<i64: 16, 32>}, {pipeline_mode = #tpu.pipeline_mode<synchronous>, transform_indices = @transform_1, window_bounds = array<i64: 1, 16>}, {transform_indices = @transform_2, window_bounds = array<i64: 16, 1>}, {pipeline_mode = #tpu.pipeline_mode<synchronous>, transform_indices = @transform_3, window_bounds = array<i64: 1, 16>}, {transform_indices = @transform_4, window_bounds = array<i64: 16, 1>}, {transform_indices = @transform_5, window_bounds = array<i64: 1, 1, 16>}]} {
    %c16_i32 = arith.constant 16 : i32
    %0 = arith.muli %arg0, %c16_i32 : i32
    %1 = tpu.assume_multiple %0, 16 : i32
    %2 = arith.index_cast %1 : i32 to index
    %c0 = arith.constant 0 : index
    %3 = vector.load %arg1[%2, %c0] : memref<16x32xbf16, #tpu.memory_space<vmem>>, vector<16x32xbf16>
    %c0_0 = arith.constant 0 : index
    %c0_1 = arith.constant 0 : index
    %4 = vector.load %arg1[%c0_0, %c0_1] : memref<16x32xbf16, #tpu.memory_space<vmem>>, vector<16x32xbf16>
    %cst = arith.constant dense<0.000000e+00> : vector<16x16xf32>
    %5 = tpu.matmul %3, %4, %cst {dimension_numbers = #tpu.dot_dimension_numbers<[1], [1], [0], [0], [0, 0, 1, 0], [], []>} : vector<16x32xbf16>, vector<16x32xbf16>, vector<16x16xf32> -> vector<16x16xf32>
    %c0_2 = arith.constant 0 : index
    %c0_3 = arith.constant 0 : index
    %6 = vector.load %arg2[%c0_2, %c0_3] : memref<1x16xi32, #tpu.memory_space<vmem>>, vector<1x16xi32>
    %c0_4 = arith.constant 0 : index
    %c0_5 = arith.constant 0 : index
    %7 = vector.load %arg3[%c0_4, %c0_5] : memref<16x1xi32, #tpu.memory_space<vmem>>, vector<16x1xi32>
    %c0_6 = arith.constant 0 : index
    %c0_7 = arith.constant 0 : index
    %8 = vector.load %arg4[%c0_6, %c0_7] : memref<1x16xi32, #tpu.memory_space<vmem>>, vector<1x16xi32>
    %c0_8 = arith.constant 0 : index
    %c0_9 = arith.constant 0 : index
    %9 = vector.load %arg5[%c0_8, %c0_9] : memref<16x1xi32, #tpu.memory_space<vmem>>, vector<16x1xi32>
    %10 = vector.broadcast %7 : vector<16x1xi32> to vector<16x16xi32>
    %11 = vector.broadcast %6 : vector<1x16xi32> to vector<16x16xi32>
    %12 = arith.cmpi eq, %10, %11 : vector<16x16xi32>
    %13 = vector.broadcast %9 : vector<16x1xi32> to vector<16x16xi32>
    %14 = vector.broadcast %8 : vector<1x16xi32> to vector<16x16xi32>
    %15 = arith.cmpi eq, %13, %14 : vector<16x16xi32>
    %16 = tpu.iota {dimensions = array<i32: 1>} : vector<1x16xi32>
    %17 = tpu.iota {dimensions = array<i32: 0>} : vector<16x1xi32>
    %c16_i32_10 = arith.constant 16 : i32
    %18 = arith.muli %arg0, %c16_i32_10 : i32
    %19 = vector.broadcast %18 : i32 to vector<16x1xi32>
    %20 = arith.addi %17, %19 : vector<16x1xi32>
    %c8_i32 = arith.constant 8 : i32
    %21 = vector.broadcast %c8_i32 : i32 to vector<16x1xi32>
    %22 = arith.cmpi slt, %20, %21 : vector<16x1xi32>
    %c8_i32_11 = arith.constant 8 : i32
    %23 = vector.broadcast %c8_i32_11 : i32 to vector<1x16xi32>
    %24 = arith.cmpi slt, %16, %23 : vector<1x16xi32>
    %25 = vector.broadcast %22 : vector<16x1xi1> to vector<16x16xi1>
    %26 = vector.broadcast %24 : vector<1x16xi1> to vector<16x16xi1>
    %27 = arith.andi %25, %26 : vector<16x16xi1>
    %28 = arith.andi %12, %15 : vector<16x16xi1>
    %cst_12 = arith.constant dense<true> : vector<16x16xi1>
    %29 = arith.xori %12, %cst_12 : vector<16x16xi1>
    %cst_13 = arith.constant dense<true> : vector<16x16xi1>
    %30 = arith.xori %15, %cst_13 : vector<16x16xi1>
    %31 = arith.andi %29, %30 : vector<16x16xi1>
    %cst_14 = arith.constant dense<true> : vector<16x16xi1>
    %32 = arith.xori %28, %cst_14 : vector<16x16xi1>
    %33 = arith.andi %32, %27 : vector<16x16xi1>
    %34 = arith.andi %31, %27 : vector<16x16xi1>
    %35 = arith.ori %12, %15 : vector<16x16xi1>
    %36 = arith.andi %35, %27 : vector<16x16xi1>
    %37 = math.exp %5 : vector<16x16xf32>
    %cst_15 = arith.constant 0.000000e+00 : f32
    %38 = vector.broadcast %cst_15 : f32 to vector<16x16xf32>
    %39 = arith.select %33, %37, %38 : vector<16x16xi1>, vector<16x16xf32>
    %cst_16 = arith.constant dense<0.000000e+00> : vector<16xf32>
    %40 = vector.multi_reduction <add>, %39, %cst_16 [1] : vector<16x16xf32> to vector<16xf32>
    %41 = vector.shape_cast %40 : vector<16xf32> to vector<16x1xf32>
    %cst_17 = arith.constant 0.000000e+00 : f32
    %42 = vector.broadcast %cst_17 : f32 to vector<16x16xf32>
    %43 = arith.select %34, %37, %42 : vector<16x16xi1>, vector<16x16xf32>
    %cst_18 = arith.constant dense<0.000000e+00> : vector<16xf32>
    %44 = vector.multi_reduction <add>, %43, %cst_18 [1] : vector<16x16xf32> to vector<16xf32>
    %45 = vector.shape_cast %44 : vector<16xf32> to vector<16x1xf32>
    %46 = vector.shape_cast %41 : vector<16x1xf32> to vector<16x1xf32>
    %47 = vector.broadcast %46 : vector<16x1xf32> to vector<16x16xf32>
    %48 = vector.shape_cast %45 : vector<16x1xf32> to vector<16x1xf32>
    %49 = vector.broadcast %48 : vector<16x1xf32> to vector<16x16xf32>
    %50 = arith.select %28, %47, %49 : vector<16x16xi1>, vector<16x16xf32>
    %51 = arith.addf %37, %50 : vector<16x16xf32>
    %52 = math.log %51 : vector<16x16xf32>
    %53 = arith.subf %52, %5 : vector<16x16xf32>
    %cst_19 = arith.constant 0.000000e+00 : f32
    %54 = vector.broadcast %cst_19 : f32 to vector<16x16xf32>
    %55 = arith.select %36, %53, %54 : vector<16x16xi1>, vector<16x16xf32>
    %cst_20 = arith.constant dense<0.000000e+00> : vector<16xf32>
    %56 = vector.multi_reduction <add>, %55, %cst_20 [0] : vector<16x16xf32> to vector<16xf32>
    %57 = vector.shape_cast %56 : vector<16xf32> to vector<1x16xf32>
    %58 = vector.shape_cast %57 : vector<1x16xf32> to vector<1x1x16xf32>
    %c0_21 = arith.constant 0 : index
    %c0_22 = arith.constant 0 : index
    %c0_23 = arith.constant 0 : index
    %59 = vector.load %arg6[%c0_21, %c0_22, %c0_23] : memref<1x1x16xf32, #tpu.memory_space<vmem>>, vector<1x1x16xf32>
    tpu.vector_store %arg6[%c0_21, %c0_22, %c0_23], %58 {strides = array<i32>} : memref<1x1x16xf32, #tpu.memory_space<vmem>>, vector<1x1x16xf32>,
    return
  }
  func.func @transform_0(%arg0: i32) -> (i32, i32) {
    %c0_i32 = arith.constant 0 : i32
    %c0_i32_0 = arith.constant 0 : i32
    %c0_i32_1 = arith.constant 0 : i32
    return %c0_i32, %c0_i32_0 : i32, i32
  }
  func.func @transform_1(%arg0: i32) -> (i32, i32) {
    %c0_i32 = arith.constant 0 : i32
    %c0_i32_0 = arith.constant 0 : i32
    %c0_i32_1 = arith.constant 0 : i32
    return %c0_i32, %c0_i32_0 : i32, i32
  }
  func.func @transform_2(%arg0: i32) -> (i32, i32) {
    %c0_i32 = arith.constant 0 : i32
    %c0_i32_0 = arith.constant 0 : i32
    return %arg0, %c0_i32 : i32, i32
  }
  func.func @transform_3(%arg0: i32) -> (i32, i32) {
    %c0_i32 = arith.constant 0 : i32
    %c0_i32_0 = arith.constant 0 : i32
    %c0_i32_1 = arith.constant 0 : i32
    return %c0_i32, %c0_i32_0 : i32, i32
  }
  func.func @transform_4(%arg0: i32) -> (i32, i32) {
    %c0_i32 = arith.constant 0 : i32
    %c0_i32_0 = arith.constant 0 : i32
    return %arg0, %c0_i32 : i32, i32
  }
  func.func @transform_5(%arg0: i32) -> (i32, i32, i32) {
    %c0_i32 = arith.constant 0 : i32
    %c0_i32_0 = arith.constant 0 : i32
    %c0_i32_1 = arith.constant 0 : i32
    return %arg0, %c0_i32, %c0_i32_0 : i32, i32, i32
  }
}

module attributes {stable_mosaic.version = 11 : i64} {
  func.func @_npairs_loss_kernel(%arg0: i32, %arg1: memref<16x32xbf16, #tpu.memory_space<vmem>>, %arg2: memref<1x16xi32, #tpu.memory_space<vmem>>, %arg3: memref<16x1xi32, #tpu.memory_space<vmem>>, %arg4: memref<1x16xi32, #tpu.memory_space<vmem>>, %arg5: memref<16x1xi32, #tpu.memory_space<vmem>>, %arg6: memref<1x1x16xf32, #tpu.memory_space<vmem>>) attributes {dimension_semantics = [#tpu.dimension_semantics<parallel>], iteration_bounds = array<i64: 1>, scalar_prefetch = 0 : i64, scratch_operands = 0 : i64, tpu.core_type = #tpu.core_type<tc>, window_params = [{pipeline_mode = #tpu.pipeline_mode<synchronous>, transform_indices = @transform_0, window_bounds = array<i64: 16, 32>}, {pipeline_mode = #tpu.pipeline_mode<synchronous>, transform_indices = @transform_1, window_bounds = array<i64: 1, 16>}, {transform_indices = @transform_2, window_bounds = array<i64: 16, 1>}, {pipeline_mode = #tpu.pipeline_mode<synchronous>, transform_indices = @transform_3, window_bounds = array<i64: 1, 16>}, {transform_indices = @transform_4, window_bounds = array<i64: 16, 1>}, {transform_indices = @transform_5, window_bounds = array<i64: 1, 1, 16>}]} {
    %c16_i32 = arith.constant 16 : i32
    %0 = arith.muli %arg0, %c16_i32 : i32
    %1 = tpu.assume_multiple %0, 16 : i32
    %2 = arith.index_cast %1 : i32 to index
    %c0 = arith.constant 0 : index
    %3 = vector.load %arg1[%2, %c0] : memref<16x32xbf16, #tpu.memory_space<vmem>>, vector<16x32xbf16>
    %c0_0 = arith.constant 0 : index
    %c0_1 = arith.constant 0 : index
    %4 = vector.load %arg1[%c0_0, %c0_1] : memref<16x32xbf16, #tpu.memory_space<vmem>>, vector<16x32xbf16>
    %cst = arith.constant dense<0.000000e+00> : vector<16x16xf32>
    %5 = tpu.matmul %3, %4, %cst {dimension_numbers = #tpu.dot_dimension_numbers<[1], [1], [0], [0], [0, 0, 1, 0], [], []>} : vector<16x32xbf16>, vector<16x32xbf16>, vector<16x16xf32> -> vector<16x16xf32>
    %c0_2 = arith.constant 0 : index
    %c0_3 = arith.constant 0 : index
    %6 = vector.load %arg2[%c0_2, %c0_3] : memref<1x16xi32, #tpu.memory_space<vmem>>, vector<1x16xi32>
    %c0_4 = arith.constant 0 : index
    %c0_5 = arith.constant 0 : index
    %7 = vector.load %arg3[%c0_4, %c0_5] : memref<16x1xi32, #tpu.memory_space<vmem>>, vector<16x1xi32>
    %c0_6 = arith.constant 0 : index
    %c0_7 = arith.constant 0 : index
    %8 = vector.load %arg4[%c0_6, %c0_7] : memref<1x16xi32, #tpu.memory_space<vmem>>, vector<1x16xi32>
    %c0_8 = arith.constant 0 : index
    %c0_9 = arith.constant 0 : index
    %9 = vector.load %arg5[%c0_8, %c0_9] : memref<16x1xi32, #tpu.memory_space<vmem>>, vector<16x1xi32>
    %10 = vector.broadcast %7 : vector<16x1xi32> to vector<16x16xi32>
    %11 = vector.broadcast %6 : vector<1x16xi32> to vector<16x16xi32>
    %12 = arith.cmpi eq, %10, %11 : vector<16x16xi32>
    %13 = vector.broadcast %9 : vector<16x1xi32> to vector<16x16xi32>
    %14 = vector.broadcast %8 : vector<1x16xi32> to vector<16x16xi32>
    %15 = arith.cmpi eq, %13, %14 : vector<16x16xi32>
    %16 = tpu.iota {dimensions = array<i32: 1>} : vector<1x16xi32>
    %17 = tpu.iota {dimensions = array<i32: 0>} : vector<16x1xi32>
    %c16_i32_10 = arith.constant 16 : i32
    %18 = arith.muli %arg0, %c16_i32_10 : i32
    %19 = vector.broadcast %18 : i32 to vector<16x1xi32>
    %20 = arith.addi %17, %19 : vector<16x1xi32>
    %c8_i32 = arith.constant 8 : i32
    %21 = vector.broadcast %c8_i32 : i32 to vector<16x1xi32>
    %22 = arith.cmpi slt, %20, %21 : vector<16x1xi32>
    %c8_i32_11 = arith.constant 8 : i32
    %23 = vector.broadcast %c8_i32_11 : i32 to vector<1x16xi32>
    %24 = arith.cmpi slt, %16, %23 : vector<1x16xi32>
    %25 = vector.broadcast %22 : vector<16x1xi1> to vector<16x16xi1>
    %26 = vector.broadcast %24 : vector<1x16xi1> to vector<16x16xi1>
    %27 = arith.andi %25, %26 : vector<16x16xi1>
    %28 = arith.andi %12, %15 : vector<16x16xi1>
    %cst_12 = arith.constant dense<true> : vector<16x16xi1>
    %29 = arith.xori %12, %cst_12 : vector<16x16xi1>
    %cst_13 = arith.constant dense<true> : vector<16x16xi1>
    %30 = arith.xori %15, %cst_13 : vector<16x16xi1>
    %31 = arith.andi %29, %30 : vector<16x16xi1>
    %cst_14 = arith.constant dense<true> : vector<16x16xi1>
    %32 = arith.xori %28, %cst_14 : vector<16x16xi1>
    %33 = arith.andi %32, %27 : vector<16x16xi1>
    %34 = arith.andi %31, %27 : vector<16x16xi1>
    %35 = arith.ori %12, %15 : vector<16x16xi1>
    %36 = arith.andi %35, %27 : vector<16x16xi1>
    %37 = math.exp %5 : vector<16x16xf32>
    %cst_15 = arith.constant 0.000000e+00 : f32
    %38 = vector.broadcast %cst_15 : f32 to vector<16x16xf32>
    %39 = arith.select %33, %37, %38 : vector<16x16xi1>, vector<16x16xf32>
    %cst_16 = arith.constant dense<0.000000e+00> : vector<16xf32>
    %40 = vector.multi_reduction <add>, %39, %cst_16 [1] : vector<16x16xf32> to vector<16xf32>
    %41 = vector.shape_cast %40 : vector<16xf32> to vector<16x1xf32>
    %cst_17 = arith.constant 0.000000e+00 : f32
    %42 = vector.broadcast %cst_17 : f32 to vector<16x16xf32>
    %43 = arith.select %34, %37, %42 : vector<16x16xi1>, vector<16x16xf32>
    %cst_18 = arith.constant dense<0.000000e+00> : vector<16xf32>
    %44 = vector.multi_reduction <add>, %43, %cst_18 [1] : vector<16x16xf32> to vector<16xf32>
    %45 = vector.shape_cast %44 : vector<16xf32> to vector<16x1xf32>
    %46 = vector.shape_cast %41 : vector<16x1xf32> to vector<16x1xf32>
    %47 = vector.broadcast %46 : vector<16x1xf32> to vector<16x16xf32>
    %48 = vector.shape_cast %45 : vector<16x1xf32> to vector<16x1xf32>
    %49 = vector.broadcast %48 : vector<16x1xf32> to vector<16x16xf32>
    %50 = arith.select %28, %47, %49 : vector<16x16xi1>, vector<16x16xf32>
    %51 = arith.addf %37, %50 : vector<16x16xf32>
    %52 = math.log %51 : vector<16x16xf32>
    %53 = arith.subf %52, %5 : vector<16x16xf32>
    %cst_19 = arith.constant 0.000000e+00 : f32
    %54 = vector.broadcast %cst_19 : f32 to vector<16x16xf32>
    %55 = arith.select %36, %53, %54 : vector<16x16xi1>, vector<16x16xf32>
    %cst_20 = arith.constant dense<0.000000e+00> : vector<16xf32>
    %56 = vector.multi_reduction <add>, %55, %cst_20 [0] : vector<16x16xf32> to vector<16xf32>
    %57 = vector.shape_cast %56 : vector<16xf32> to vector<1x16xf32>
    %58 = vector.shape_cast %57 : vector<1x16xf32> to vector<1x1x16xf32>
    %c0_21 = arith.constant 0 : index
    %c0_22 = arith.constant 0 : index
    %c0_23 = arith.constant 0 : index
    %59 = vector.load %arg6[%c0_21, %c0_22, %c0_23] : memref<1x1x16xf32, #tpu.memory_space<vmem>>, vector<1x1x16xf32>
    tpu.vector_store %arg6[%c0_21, %c0_22, %c0_23], %58 {strides = array<i32>} : memref<1x1x16xf32, #tpu.memory_space<vmem>>, vector<1x1x16xf32>,
    return
  }
  func.func @transform_0(%arg0: i32) -> (i32, i32) {
    %c0_i32 = arith.constant 0 : i32
    %c0_i32_0 = arith.constant 0 : i32
    %c0_i32_1 = arith.constant 0 : i32
    return %c0_i32, %c0_i32_0 : i32, i32
  }
  func.func @transform_1(%arg0: i32) -> (i32, i32) {
    %c0_i32 = arith.constant 0 : i32
    %c0_i32_0 = arith.constant 0 : i32
    %c0_i32_1 = arith.constant 0 : i32
    return %c0_i32, %c0_i32_0 : i32, i32
  }
  func.func @transform_2(%arg0: i32) -> (i32, i32) {
    %c0_i32 = arith.constant 0 : i32
    %c0_i32_0 = arith.constant 0 : i32
    return %arg0, %c0_i32 : i32, i32
  }
  func.func @transform_3(%arg0: i32) -> (i32, i32) {
    %c0_i32 = arith.constant 0 : i32
    %c0_i32_0 = arith.constant 0 : i32
    %c0_i32_1 = arith.constant 0 : i32
    return %c0_i32, %c0_i32_0 : i32, i32
  }
  func.func @transform_4(%arg0: i32) -> (i32, i32) {
    %c0_i32 = arith.constant 0 : i32
    %c0_i32_0 = arith.constant 0 : i32
    return %arg0, %c0_i32 : i32, i32
  }
  func.func @transform_5(%arg0: i32) -> (i32, i32, i32) {
    %c0_i32 = arith.constant 0 : i32
    %c0_i32_0 = arith.constant 0 : i32
    %c0_i32_1 = arith.constant 0 : i32
    return %arg0, %c0_i32, %c0_i32_0 : i32, i32, i32
  }
}

</mosaic_0001>

<bundles_post_ra>
// kernel: tpu_custom_call.1
= control target key start
LH: loop header
LB: loop body
LE: loop exit
PB: predicated region body
PF: predicated region fallthrough
CT: control target
= control target key end

     0   :  { %v263_v1 = vmov 0.0   ;;  %vm41_vm0 = vcmask 261120   ;;  %vm264_vm1 = vmmov 0   ;;  %v265_v4 = vmov 0   ;;  %s339_s0 = inlined_call_operand.vmem [shape: bf16[16,32], index: 0, kind: input, shape index: {}]   ;;  %s340_s1 = inlined_call_operand.vmem [shape: s32[1,16], index: 1, kind: input, shape index: {}]   ;;  %s341_s2 = inlined_call_operand.vmem [shape: s32[16,1], index: 2, kind: input, shape index: {}]   ;;  %s342_s3 = inlined_call_operand.vmem [shape: s32[1,16], index: 3, kind: input, shape index: {}]   ;;  %s343_s4 = inlined_call_operand.vmem [shape: s32[16,1], index: 4, kind: input, shape index: {}]   ;;  %s344_s5 = inlined_call_operand.hbm [shape: f32[1,1,16], index: 5, kind: output, shape index: {}]  }
   0x1   :  { %v235_v0 = vld [vmem:[%s339_s0] sm:$0xff]   ;;  %223 = vmatprep.subr.bf16.mxu0 %v263_v1  ;;  %225 = vmatprep.mubr.msk.bf16.mxu0 %vm264_vm1, %v263_v1 }
   0x2   :  { %v46_v2 = vsel %vm41_vm0, %v235_v0, 0  ;;  %v90_v3 = vld [vmem:[%s341_s2] sm:$0xff]  ;;  %234 = vset.pattern.permute.xlu0 %v265_v4 }
   0x3   :  { %224 = vmatpush3.bf16.xpose.msra.mxu0 %v46_v2 }
   0x4   :  { %10 = vsyncpa [#allocation3], 0  ;;  %96 = vperm.xlu0 %234, %v90_v3   ;;  %v93_v5 = vld [vmem:[%s343_s4] sm:$0xff]  ;;  %v119_v7 = vlaneseq  ;;  %vm266_vm8 = vmmov 1   ;;  %vm162_vm12 = vcmask 130048  }
   0x5   :  { %v236_v6 = vld [vmem:[%s339_s0] sm:$0xff]   ;;  %s267_s0 = smov [#allocation2]  }
   0x6   :  { %v219_v9 = vld [vmem:[%s340_s1] ss:$0 sm:$0xff]  ;;  %v120_v11 = vand.u32 127, %v119_v7  ;;  %s206_s1 = sshll.u32 %s267_s0, 4  ;;  %s207_s1 = int_to_ptr.vmem [resolvable:$true] %s206_s1 }
   0x7   :  { %v220_v10 = vld [vmem:[%s342_s3] ss:$0 sm:$0xff]  ;;  %s241_s3 = scalar_lea.vmem %s207_s1, 16  ;;  %s245_s4 = scalar_lea.vmem %s207_s1, 32 }
   0x8   :  { %108 = vperm.xlu0 %234, %v93_v5   ;;  %vm129_vm4 = vcmp.lt.s32.totalorder %v120_v11, 8  ;;  %p242_p0 = scmp.ne.s32.totalorder %s207_s1, %s241_s3  ;;  %p246_p1 = scmp.lt.s32.totalorder %s207_s1, %s207_s1 }
   0x9   :  { %p247_p2 = scmp.lt.s32.totalorder %s245_s4, %s241_s3 }
   0xa   :  { %226 = vmatmul.mubr.msk.bf16.vlgmr.msra.gmra.mxu0 %vm41_vm0, %v236_v6  ;;  %vm198_vm0 = vcmask 122880  }
   0xb   :  { %p248_p3 = por %p247_p2, %p246_p1 }
   0xd   :  { %p249_p4 = pnand %p248_p3, %p242_p0 }
  0x7f   :  { %v97_v8 = vpop.permute.xlu0 %96 }
  0x80   :  { %vm105_vm2 = vcmp.eq.s32.totalorder %v97_v8, %v219_v9 }
  0x81   :  { %vm140_vm9 = vmxor %vm105_vm2, %vm266_vm8 }
  0x83   :  { %v109_v12 = vpop.permute.xlu0 %108 }
  0x84   :  { %vm117_vm3 = vcmp.eq.s32.totalorder %v109_v12, %v220_v10 }
  0x85   :  { %vm152_vm5 = vmor %vm105_vm2, %vm117_vm3 }
  0x86   :  { %vm317_vm6 = vmand %vm152_vm5, %vm129_vm4 }
  0x87   :  { %vm321_vm7 = vmand %vm105_vm2, %vm117_vm3 }
  0x88   :  { %vm142_vm10 = vmxor %vm117_vm3, %vm266_vm8 }
  0x89   :  { %vm146_vm11 = vmxor %vm321_vm7, %vm266_vm8 }
  0x8a   :  { %vm144_vm13 = vmand %vm140_vm9, %vm142_vm10 }
  0x8b   :  { %vm148_vm14 = vmand %vm146_vm11, %vm129_vm4 }
  0x8c   :  { %vm150_vm15 = vmand %vm144_vm13, %vm129_vm4 }
  0xca   :  { %v82_v14 = vpop.f32.mrf.mxu0 }
  0xcb   :  { %v156_v15 = vmul.f32 1.442695, %v82_v14 }
  0xcc   :  { %v227_v16 = vpop.f32.mrf.mxu0 }
  0xcd   :  { %237 = vpow2.f32 %v156_v15 }
  0xce   :  { %v85_v17 = vpop.f32.mrf.mxu0 }
  0xd0   :  { %v228_v18 = vpop.f32.mrf.mxu0 }
  0xda   :  { %v238_v20 = vpop.eup %237 }
  0xdb   :  { %v160_v21 = vsel %vm148_vm14, %v238_v20, 0.0  ;;  %v169_v23 = vsel %vm150_vm15, %v238_v20, 0.0 }
  0xdc   :  { %v163_v22 = vsel %vm162_vm12, %v160_v21, 0.0  ;;  %v171_v24 = vsel %vm162_vm12, %v169_v23, 0.0 }
  0xdd   :  { %164 = vadd.xlane.f32.xlu1 %v163_v22 }
  0xe1   :  { %172 = vadd.xlane.f32.xlu1 %v171_v24 }
 0x166   :  { %v165_v25 = vpop.xlane.xlu1 %164 }
 0x16a   :  { %v173_v26 = vpop.xlane.xlu1 %172 }
 0x16b   :  { %v177_v27 = vsel %vm321_vm7, %v165_v25, %v173_v26 }
 0x16c   :  { %v179_v28 = vadd.f32 %v238_v20, %v177_v27 }
 0x16e   :  { %239 = vlog2.f32 %v179_v28 }
 0x17b   :  { %v240_v29 = vpop.eup %239 }
 0x17c   :  { %v182_v30 = vmul.f32 0.6931472, %v240_v29 }
 0x17e   :  { %v185_v31 = vsub.f32 %v182_v30, %v82_v14 }
 0x180   :  { %v187_v32 = vsel %vm317_vm6, %v185_v31, 0.0 }
 0x181   :  { %v189_v33 = vsel %vm162_vm12, %v187_v32, 0.0 }
 0x182   :  { %v192_v34 = vrot.slane %v189_v33, 4 }
 0x184   :  { %v193_v35 = vadd.f32 %v192_v34, %v189_v33 }
 0x186   :  { %v194_v36 = vrot.slane %v193_v35, 2 }
 0x188   :  { %v195_v37 = vadd.f32 %v194_v36, %v193_v35 }
 0x18a   :  { %v196_v38 = vrot.slane %v195_v37, 1 }
 0x18c   :  { %v197_v39 = vadd.f32 %v196_v38, %v195_v37 }
 0x18e   :  { %199 = vst.msk [vmem:[#allocation2] sm:$0x1] %vm198_vm0, %v197_v39 }
 0x18f   :  { %252 = shalt.err (!%p249_p4)
}
 0x190   :  { %209 = dma.vmem_to_hbm [thread:$0]  %s207_s1, 16, %s344_s5, [#allocation3]  }
 0x191   :  { %261 = dma.done.wait [#allocation3], 16  }
 0x192   :  { %262 = vsyncadd [#allocation3], 4294967280 }
 0x193   :  { %213 = vsyncpa [#allocation3], 1 }

// kernel: tpu_custom_call.1
= control target key start
LH: loop header
LB: loop body
LE: loop exit
PB: predicated region body
PF: predicated region fallthrough
CT: control target
= control target key end

     0   :  { %v263_v1 = vmov 0.0   ;;  %vm41_vm0 = vcmask 261120   ;;  %vm264_vm1 = vmmov 0   ;;  %v265_v4 = vmov 0   ;;  %s339_s0 = inlined_call_operand.vmem [shape: bf16[16,32], index: 0, kind: input, shape index: {}]   ;;  %s340_s1 = inlined_call_operand.vmem [shape: s32[1,16], index: 1, kind: input, shape index: {}]   ;;  %s341_s2 = inlined_call_operand.vmem [shape: s32[16,1], index: 2, kind: input, shape index: {}]   ;;  %s342_s3 = inlined_call_operand.vmem [shape: s32[1,16], index: 3, kind: input, shape index: {}]   ;;  %s343_s4 = inlined_call_operand.vmem [shape: s32[16,1], index: 4, kind: input, shape index: {}]   ;;  %s344_s5 = inlined_call_operand.hbm [shape: f32[1,1,16], index: 5, kind: output, shape index: {}]  }
   0x1   :  { %v235_v0 = vld [vmem:[%s339_s0] sm:$0xff]   ;;  %223 = vmatprep.subr.bf16.mxu0 %v263_v1  ;;  %225 = vmatprep.mubr.msk.bf16.mxu0 %vm264_vm1, %v263_v1 }
   0x2   :  { %v46_v2 = vsel %vm41_vm0, %v235_v0, 0  ;;  %v90_v3 = vld [vmem:[%s341_s2] sm:$0xff]  ;;  %234 = vset.pattern.permute.xlu0 %v265_v4 }
   0x3   :  { %224 = vmatpush3.bf16.xpose.msra.mxu0 %v46_v2 }
   0x4   :  { %10 = vsyncpa [#allocation3], 0  ;;  %96 = vperm.xlu0 %234, %v90_v3   ;;  %v93_v5 = vld [vmem:[%s343_s4] sm:$0xff]  ;;  %v119_v7 = vlaneseq  ;;  %vm266_vm8 = vmmov 1   ;;  %vm162_vm12 = vcmask 130048  }
   0x5   :  { %v236_v6 = vld [vmem:[%s339_s0] sm:$0xff]   ;;  %s267_s0 = smov [#allocation2]  }
   0x6   :  { %v219_v9 = vld [vmem:[%s340_s1] ss:$0 sm:$0xff]  ;;  %v120_v11 = vand.u32 127, %v119_v7  ;;  %s206_s1 = sshll.u32 %s267_s0, 4  ;;  %s207_s1 = int_to_ptr.vmem [resolvable:$true] %s206_s1 }
   0x7   :  { %v220_v10 = vld [vmem:[%s342_s3] ss:$0 sm:$0xff]  ;;  %s241_s3 = scalar_lea.vmem %s207_s1, 16  ;;  %s245_s4 = scalar_lea.vmem %s207_s1, 32 }
   0x8   :  { %108 = vperm.xlu0 %234, %v93_v5   ;;  %vm129_vm4 = vcmp.lt.s32.totalorder %v120_v11, 8  ;;  %p242_p0 = scmp.ne.s32.totalorder %s207_s1, %s241_s3  ;;  %p246_p1 = scmp.lt.s32.totalorder %s207_s1, %s207_s1 }
   0x9   :  { %p247_p2 = scmp.lt.s32.totalorder %s245_s4, %s241_s3 }
   0xa   :  { %226 = vmatmul.mubr.msk.bf16.vlgmr.msra.gmra.mxu0 %vm41_vm0, %v236_v6  ;;  %vm198_vm0 = vcmask 122880  }
   0xb   :  { %p248_p3 = por %p247_p2, %p246_p1 }
   0xd   :  { %p249_p4 = pnand %p248_p3, %p242_p0 }
  0x7f   :  { %v97_v8 = vpop.permute.xlu0 %96 }
  0x80   :  { %vm105_vm2 = vcmp.eq.s32.totalorder %v97_v8, %v219_v9 }
  0x81   :  { %vm140_vm9 = vmxor %vm105_vm2, %vm266_vm8 }
  0x83   :  { %v109_v12 = vpop.permute.xlu0 %108 }
  0x84   :  { %vm117_vm3 = vcmp.eq.s32.totalorder %v109_v12, %v220_v10 }
  0x85   :  { %vm152_vm5 = vmor %vm105_vm2, %vm117_vm3 }
  0x86   :  { %vm317_vm6 = vmand %vm152_vm5, %vm129_vm4 }
  0x87   :  { %vm321_vm7 = vmand %vm105_vm2, %vm117_vm3 }
  0x88   :  { %vm142_vm10 = vmxor %vm117_vm3, %vm266_vm8 }
  0x89   :  { %vm146_vm11 = vmxor %vm321_vm7, %vm266_vm8 }
  0x8a   :  { %vm144_vm13 = vmand %vm140_vm9, %vm142_vm10 }
  0x8b   :  { %vm148_vm14 = vmand %vm146_vm11, %vm129_vm4 }
  0x8c   :  { %vm150_vm15 = vmand %vm144_vm13, %vm129_vm4 }
  0xca   :  { %v82_v14 = vpop.f32.mrf.mxu0 }
  0xcb   :  { %v156_v15 = vmul.f32 1.442695, %v82_v14 }
  0xcc   :  { %v227_v16 = vpop.f32.mrf.mxu0 }
  0xcd   :  { %237 = vpow2.f32 %v156_v15 }
  0xce   :  { %v85_v17 = vpop.f32.mrf.mxu0 }
  0xd0   :  { %v228_v18 = vpop.f32.mrf.mxu0 }
  0xda   :  { %v238_v20 = vpop.eup %237 }
  0xdb   :  { %v160_v21 = vsel %vm148_vm14, %v238_v20, 0.0  ;;  %v169_v23 = vsel %vm150_vm15, %v238_v20, 0.0 }
  0xdc   :  { %v163_v22 = vsel %vm162_vm12, %v160_v21, 0.0  ;;  %v171_v24 = vsel %vm162_vm12, %v169_v23, 0.0 }
  0xdd   :  { %164 = vadd.xlane.f32.xlu1 %v163_v22 }
  0xe1   :  { %172 = vadd.xlane.f32.xlu1 %v171_v24 }
 0x166   :  { %v165_v25 = vpop.xlane.xlu1 %164 }
 0x16a   :  { %v173_v26 = vpop.xlane.xlu1 %172 }
 0x16b   :  { %v177_v27 = vsel %vm321_vm7, %v165_v25, %v173_v26 }
 0x16c   :  { %v179_v28 = vadd.f32 %v238_v20, %v177_v27 }
 0x16e   :  { %239 = vlog2.f32 %v179_v28 }
 0x17b   :  { %v240_v29 = vpop.eup %239 }
 0x17c   :  { %v182_v30 = vmul.f32 0.6931472, %v240_v29 }
 0x17e   :  { %v185_v31 = vsub.f32 %v182_v30, %v82_v14 }
 0x180   :  { %v187_v32 = vsel %vm317_vm6, %v185_v31, 0.0 }
 0x181   :  { %v189_v33 = vsel %vm162_vm12, %v187_v32, 0.0 }
 0x182   :  { %v192_v34 = vrot.slane %v189_v33, 4 }
 0x184   :  { %v193_v35 = vadd.f32 %v192_v34, %v189_v33 }
 0x186   :  { %v194_v36 = vrot.slane %v193_v35, 2 }
 0x188   :  { %v195_v37 = vadd.f32 %v194_v36, %v193_v35 }
 0x18a   :  { %v196_v38 = vrot.slane %v195_v37, 1 }
 0x18c   :  { %v197_v39 = vadd.f32 %v196_v38, %v195_v37 }
 0x18e   :  { %199 = vst.msk [vmem:[#allocation2] sm:$0x1] %vm198_vm0, %v197_v39 }
 0x18f   :  { %252 = shalt.err (!%p249_p4)
}
 0x190   :  { %209 = dma.vmem_to_hbm [thread:$0]  %s207_s1, 16, %s344_s5, [#allocation3]  }
 0x191   :  { %261 = dma.done.wait [#allocation3], 16  }
 0x192   :  { %262 = vsyncadd [#allocation3], 4294967280 }
 0x193   :  { %213 = vsyncpa [#allocation3], 1 }

</bundles_post_ra>
